<compile_context>
chip_gen: v7x
topology: tpu7x:2x2x1
jax: 0.10.0
libtpu: 0.0.40
codegen_flags: <defaults>
</compile_context>

<pallas_src>
import math
from functools import partial

import jax
import jax.numpy as jnp
from jax.experimental import pallas as pl
from jax.experimental.pallas import tpu as pltpu

LANE_TILE = 512   # >=512-lane tiles: ~85% of HBM roofline (vs ~29% at 128-lane tiles)


# ----------------------------- parameter setup ------------------------------

def _to_mel(hz):
    return 2595.0 * jnp.log10(1.0 + hz / 700.0)


def _to_hz(mel):
    return 700.0 * (10.0 ** (mel / 2595.0) - 1.0)


def init_sinc_params(sinc_channels, sample_rate, min_low_hz, min_band_hz):
    """Deterministic init exactly as SincConv_fast.__init__ ('mel' spacing)."""
    low_hz = 30.0
    high_hz = sample_rate / 2.0 - (min_low_hz + min_band_hz)
    mel = jnp.linspace(_to_mel(low_hz), _to_mel(high_hz), sinc_channels + 1)
    hz = _to_hz(mel)
    low_hz_ = hz[:-1].reshape(-1, 1).astype(jnp.float32)
    band_hz_ = jnp.diff(hz).reshape(-1, 1).astype(jnp.float32)
    return low_hz_, band_hz_


def make_sinc_filters(low_hz_, band_hz_, kernel_size, sample_rate,
                      min_low_hz, min_band_hz):
    """SincConv_fast.forward filter construction -> (C, K) band-pass filters."""
    # TODO(synk): only the 'mel'-spaced band-pass filter_type is implemented.
    low = min_low_hz + jnp.abs(low_hz_)                                   # (C, 1)
    high = jnp.clip(low + min_band_hz + jnp.abs(band_hz_),
                    min_low_hz, sample_rate / 2.0)                        # (C, 1)
    band = (high - low)[:, 0]                                             # (C,)

    n = (kernel_size - 1) / 2.0
    n_ = 2.0 * math.pi * jnp.arange(-n, 0.0, dtype=jnp.float32) / sample_rate  # (M,)
    n_lin = jnp.linspace(0.0, kernel_size / 2.0 - 1.0,
                         int(kernel_size / 2), dtype=jnp.float32)
    window_ = 0.54 - 0.46 * jnp.cos(2.0 * math.pi * n_lin / kernel_size)  # (M,)

    f_low = low * n_[None, :]
    f_high = high * n_[None, :]
    bp_left = ((jnp.sin(f_high) - jnp.sin(f_low)) / (n_[None, :] / 2.0)) * window_[None, :]
    bp_center = 2.0 * band[:, None]
    bp_right = bp_left[:, ::-1]
    band_pass = jnp.concatenate([bp_left, bp_center, bp_right], axis=1)
    band_pass = band_pass / (2.0 * band[:, None])
    return band_pass.astype(jnp.float32)                                  # (C, K)


# ------------------------------ Pallas kernels -------------------------------

def sinc_conv_abs_pool(x, filt, pool):
    """x: (B, L) f32, filt: (C, K) f32.

    Returns:
      y_pad : (B, C, Lp_pad) f32 -- |conv1d| + maxpool, lanes padded to LANE_TILE mult
      stats : (B, C, 2)      f32 -- per-channel [sum, sum_sq] over VALID lanes
      L_pool: int                -- valid pooled length
    """
    B, L = x.shape
    C, K = filt.shape
    L_out = L - K + 1                 # conv1d, stride=1, padding=0, no bias
    L_pool = L_out // pool            # MaxPool1d(pool): stride=pool, floor mode
    LT = LANE_TILE
    Lp_pad = ((max(L_pool, 1) + LT - 1) // LT) * LT
    T = Lp_pad // LT
    M = K + pool - 1                  # number of phase-shifted input rows

    # Wrapper-side layout plumbing (XLA): zero-pad, then phase-decompose so that
    # xs[b, m, j] = x[b, pool*j + m].  Each pool phase then becomes one
    # full-block (C, M) x (M, LT) MXU matmul with no sublane-offset slicing.
    # TODO(synk): for very large K, build this M-row slab in VMEM from halo tiles
    # instead of materializing it in HBM (xs re-reads x roughly K/pool times).
    Lx = pool * Lp_pad + M
    x_pad = jnp.pad(x, ((0, 0), (0, Lx - L)))
    xs = jnp.stack([x_pad[:, m:m + pool * Lp_pad:pool] for m in range(M)], axis=1)

    # Tiny per-phase zero-padded weight mats: W[p, c, m] = filt[c, m - p].
    # (Replaces the old lane-broadcast (K, C, LT) weight slab that blew VMEM.)
    W = jnp.zeros((pool, C, M), jnp.float32)
    for p in range(pool):
        W = W.at[p, :, p:p + K].set(filt)

    def kernel(xs_ref, w_ref, y_ref, st_ref):
        t = pl.program_id(1)
        xm = xs_ref[0]                                        # (M, LT)
        # conv -> abs -> maxpool == max over pool phases of |W_p @ xs| (MXU).
        pooled = jnp.abs(jnp.dot(w_ref[0], xm, preferred_element_type=jnp.float32))
        for p in range(1, pool):
            pooled = jnp.maximum(
                pooled,
                jnp.abs(jnp.dot(w_ref[p], xm, preferred_element_type=jnp.float32)))
        y_ref[0] = pooled

        # Fused BatchNorm partial sums; padded lanes excluded.  VALU has slack
        # now that the conv runs on the MXU, so the per-tile mask is cheap.
        lane = jax.lax.broadcasted_iota(jnp.int32, (C, LT), 1) + t * LT
        pm = jnp.where(lane < L_pool, pooled, 0.0)
        part = jnp.concatenate(
            [jnp.sum(pm, axis=1, keepdims=True),
             jnp.sum(pm * pm, axis=1, keepdims=True)], axis=1)   # (C, 2)

        # Accumulate across the lane-tile axis in the resident output block.
        @pl.when(t == 0)
        def _():
            st_ref[0] = jnp.zeros((C, 2), jnp.float32)

        st_ref[0] += part

    y_pad, stats = pl.pallas_call(
        kernel,
        out_shape=(jax.ShapeDtypeStruct((B, C, Lp_pad), jnp.float32),
                   jax.ShapeDtypeStruct((B, C, 2), jnp.float32)),
        grid=(B, T),
        in_specs=[pl.BlockSpec((1, M, LT), lambda b, t: (b, 0, t)),
                  pl.BlockSpec((pool, C, M), lambda b, t: (0, 0, 0))],
        out_specs=(pl.BlockSpec((1, C, LT), lambda b, t: (b, 0, t)),
                   pl.BlockSpec((1, C, 2), lambda b, t: (b, 0, 0))),
        compiler_params=pltpu.CompilerParams(
            dimension_semantics=("parallel", "arbitrary")),
    )(xs, W)
    return y_pad, stats, L_pool


def bn_leakyrelu(y_pad, scale, shift, slope):
    """y_pad: (B, C, Lp_pad), scale/shift: (C, 1).  leaky_relu(y*scale + shift), in place."""
    B, C, Lp_pad = y_pad.shape
    LT = LANE_TILE
    T = Lp_pad // LT

    def kernel(y_ref, sc_ref, sh_ref, o_ref):
        z = y_ref[0] * sc_ref[...] + sh_ref[...]              # (C, LT)
        o_ref[0] = jnp.where(z >= 0, z, slope * z)

    return pl.pallas_call(
        kernel,
        out_shape=jax.ShapeDtypeStruct((B, C, Lp_pad), jnp.float32),
        grid=(B, T),
        in_specs=[pl.BlockSpec((1, C, LT), lambda b, t: (b, 0, t)),
                  pl.BlockSpec((C, 1), lambda b, t: (0, 0)),
                  pl.BlockSpec((C, 1), lambda b, t: (0, 0))],
        out_specs=pl.BlockSpec((1, C, LT), lambda b, t: (b, 0, t)),
        input_output_aliases={0: 0},          # write the mem-bound pass in place
        compiler_params=pltpu.CompilerParams(
            dimension_semantics=("parallel", "parallel")),
    )(y_pad, scale, shift)


# ------------------------------ forward wrapper ------------------------------

@partial(jax.jit, static_argnames=("kernel_size", "sample_rate", "min_low_hz",
                                   "min_band_hz", "pool", "slope", "eps"))
def sinc_filter_forward(x, params, *, kernel_size, sample_rate,
                        min_low_hz, min_band_hz, pool=3, slope=0.3, eps=1e-5):
    if kernel_size % 2 == 0:          # SincConv_fast forces odd kernel size
        kernel_size += 1
    filt = make_sinc_filters(params["low_hz_"], params["band_hz_"], kernel_size,
                             sample_rate, min_low_hz, min_band_hz)
    B = x.shape[0]
    y_pad, stats, L_pool = sinc_conv_abs_pool(x, filt, pool)   # (B, C, Lp_pad)

    # BatchNorm1d in training mode: per-channel batch stats over (B, L_pool),
    # biased variance (PyTorch normalization semantics), built from the fused
    # per-channel partial sums -> no extra HBM pass over the pooled activations.
    # TODO(synk): running_mean/running_var buffer updates (module side effects)
    # are not modeled; the one-pass E[x^2]-E[x]^2 variance is clamped at 0 but is
    # less numerically robust than a two-pass reduction for very long sequences.
    totals = jnp.sum(stats, axis=0)                            # (C, 2)
    n = B * L_pool
    mean = totals[:, 0] / n
    var = jnp.maximum(totals[:, 1] / n - mean * mean, 0.0)
    inv_std = jax.lax.rsqrt(var + eps)
    scale = (params["gamma"] * inv_std)[:, None].astype(jnp.float32)
    shift = (params["beta"] - mean * params["gamma"] * inv_std)[:, None].astype(jnp.float32)

    out_pad = bn_leakyrelu(y_pad, scale, shift, slope)
    return out_pad[:, :, :L_pool]                              # strip lane padding


# ------------------------------- reference -----------------------------------

def reference_forward(x, filt, gamma, beta, pool, slope, eps):
    B, L = x.shape
    C, K = filt.shape
    conv = jax.lax.conv_general_dilated(
        x[:, None, :], filt[:, None, :], window_strides=(1,), padding="VALID",
        dimension_numbers=("NCH", "OIH", "NCH"),
        precision=jax.lax.Precision.HIGHEST)
    conv = jnp.abs(conv)
    L_out = conv.shape[-1]
    Lp = L_out // pool
    pooled = jnp.max(conv[:, :, :Lp * pool].reshape(B, C, Lp, pool), axis=-1)
    mean = pooled.mean(axis=(0, 2))
    var = ((pooled - mean[None, :, None]) ** 2).mean(axis=(0, 2))
    z = (pooled - mean[None, :, None]) / jnp.sqrt(var + eps)[None, :, None]
    z = z * gamma[None, :, None] + beta[None, :, None]
    return jnp.where(z >= 0, z, slope * z)


# --------------------------------- main ---------------------------------------

if __name__ == "__main__":
    # Module hyper-parameters (small, consistent with SincFilter.__init__).
    sinc_channels = 8
    sinc_filter_length = 17
    sinc_filter_type = "mel"
    min_low_hz = 50.0
    min_band_hz = 50.0
    maxpool_kernel_size = 3
    leakyrelu_slope = 0.3
    sample_rate = 16000.0

    B, L = 2, 64
    key = jax.random.PRNGKey(0)
    x = jax.random.normal(key, (B, L), dtype=jnp.float32)

    low_hz_, band_hz_ = init_sinc_params(sinc_channels, sample_rate,
                                         min_low_hz, min_band_hz)
    params = {
        "low_hz_": low_hz_,                                   # (C, 1)
        "band_hz_": band_hz_,                                 # (C, 1)
        "gamma": jnp.ones((sinc_channels,), jnp.float32),     # BatchNorm weight
        "beta": jnp.zeros((sinc_channels,), jnp.float32),     # BatchNorm bias
    }

    out = sinc_filter_forward(
        x, params, kernel_size=sinc_filter_length, sample_rate=sample_rate,
        min_low_hz=min_low_hz, min_band_hz=min_band_hz,
        pool=maxpool_kernel_size, slope=leakyrelu_slope)
    out = jax.block_until_ready(out)

    # Sanity check against a plain-JAX reference.
    filt = make_sinc_filters(params["low_hz_"], params["band_hz_"],
                             sinc_filter_length, sample_rate,
                             min_low_hz, min_band_hz)
    ref = reference_forward(x, filt, params["gamma"], params["beta"],
                            maxpool_kernel_size, leakyrelu_slope, 1e-5)
    assert out.shape == ref.shape == (B, sinc_channels, (L - sinc_filter_length + 1) // 3)
    assert jnp.allclose(out, ref, atol=1e-3, rtol=1e-3)

    print("KERNEL_OK")
</pallas_src>

<mosaic_0001>
module attributes {stable_mosaic.version = 11 : i64} {
  func.func @kernel(%arg0: i32, %arg1: i32, %arg2: memref<1x19x512xf32, #tpu.memory_space<vmem>>, %arg3: memref<3x8x19xf32, #tpu.memory_space<vmem>>, %arg4: memref<1x8x512xf32, #tpu.memory_space<vmem>>, %arg5: memref<1x8x2xf32, #tpu.memory_space<vmem>>) attributes {dimension_semantics = [#tpu.dimension_semantics<parallel>, #tpu.dimension_semantics<arbitrary>], iteration_bounds = array<i64: 2, 1>, scalar_prefetch = 0 : i64, scratch_operands = 0 : i64, tpu.core_type = #tpu.core_type<tc>, window_params = [{transform_indices = @transform_0, window_bounds = array<i64: 1, 19, 512>}, {pipeline_mode = #tpu.pipeline_mode<synchronous>, transform_indices = @transform_1, window_bounds = array<i64: 3, 8, 19>}, {transform_indices = @transform_2, window_bounds = array<i64: 1, 8, 512>}, {transform_indices = @transform_3, window_bounds = array<i64: 1, 8, 2>}]} {
    %c0 = arith.constant 0 : index
    %c0_0 = arith.constant 0 : index
    %c0_1 = arith.constant 0 : index
    %0 = vector.load %arg2[%c0, %c0_0, %c0_1] : memref<1x19x512xf32, #tpu.memory_space<vmem>>, vector<1x19x512xf32>
    %1 = vector.shape_cast %0 : vector<1x19x512xf32> to vector<19x512xf32>
    %c0_2 = arith.constant 0 : index
    %c0_3 = arith.constant 0 : index
    %c0_4 = arith.constant 0 : index
    %2 = vector.load %arg3[%c0_2, %c0_3, %c0_4] : memref<3x8x19xf32, #tpu.memory_space<vmem>>, vector<1x8x19xf32>
    %3 = vector.shape_cast %2 : vector<1x8x19xf32> to vector<8x19xf32>
    %cst = arith.constant dense<0.000000e+00> : vector<8x512xf32>
    %4 = tpu.matmul %3, %1, %cst {dimension_numbers = #tpu.dot_dimension_numbers<[1], [0], [0], [1], [0, 0, 1, 1], [], []>} : vector<8x19xf32>, vector<19x512xf32>, vector<8x512xf32> -> vector<8x512xf32>
    %5 = math.absf %4 : vector<8x512xf32>
    %c1 = arith.constant 1 : index
    %c0_5 = arith.constant 0 : index
    %c0_6 = arith.constant 0 : index
    %6 = vector.load %arg3[%c1, %c0_5, %c0_6] : memref<3x8x19xf32, #tpu.memory_space<vmem>>, vector<1x8x19xf32>
    %7 = vector.shape_cast %6 : vector<1x8x19xf32> to vector<8x19xf32>
    %cst_7 = arith.constant dense<0.000000e+00> : vector<8x512xf32>
    %8 = tpu.matmul %7, %1, %cst_7 {dimension_numbers = #tpu.dot_dimension_numbers<[1], [0], [0], [1], [0, 0, 1, 1], [], []>} : vector<8x19xf32>, vector<19x512xf32>, vector<8x512xf32> -> vector<8x512xf32>
    %9 = math.absf %8 : vector<8x512xf32>
    %10 = arith.maximumf %5, %9 : vector<8x512xf32>
    %c2 = arith.constant 2 : index
    %c0_8 = arith.constant 0 : index
    %c0_9 = arith.constant 0 : index
    %11 = vector.load %arg3[%c2, %c0_8, %c0_9] : memref<3x8x19xf32, #tpu.memory_space<vmem>>, vector<1x8x19xf32>
    %12 = vector.shape_cast %11 : vector<1x8x19xf32> to vector<8x19xf32>
    %cst_10 = arith.constant dense<0.000000e+00> : vector<8x512xf32>
    %13 = tpu.matmul %12, %1, %cst_10 {dimension_numbers = #tpu.dot_dimension_numbers<[1], [0], [0], [1], [0, 0, 1, 1], [], []>} : vector<8x19xf32>, vector<19x512xf32>, vector<8x512xf32> -> vector<8x512xf32>
    %14 = math.absf %13 : vector<8x512xf32>
    %15 = arith.maximumf %10, %14 : vector<8x512xf32>
    %c0_11 = arith.constant 0 : index
    %c0_12 = arith.constant 0 : index
    %c0_13 = arith.constant 0 : index
    %16 = vector.load %arg4[%c0_11, %c0_12, %c0_13] : memref<1x8x512xf32, #tpu.memory_space<vmem>>, vector<1x8x512xf32>
    %17 = vector.shape_cast %16 : vector<1x8x512xf32> to vector<8x512xf32>
    %18 = vector.shape_cast %15 : vector<8x512xf32> to vector<1x8x512xf32>
    tpu.vector_store %arg4[%c0_11, %c0_12, %c0_13], %18 {strides = array<i32>} : memref<1x8x512xf32, #tpu.memory_space<vmem>>, vector<1x8x512xf32>,
    %19 = tpu.iota {dimensions = array<i32: 1>} : vector<8x512xi32>
    %c512_i32 = arith.constant 512 : i32
    %20 = arith.muli %arg1, %c512_i32 : i32
    %21 = vector.broadcast %20 : i32 to vector<8x512xi32>
    %22 = arith.addi %19, %21 : vector<8x512xi32>
    %c16_i32 = arith.constant 16 : i32
    %23 = vector.broadcast %c16_i32 : i32 to vector<8x512xi32>
    %24 = arith.cmpi slt, %22, %23 : vector<8x512xi32>
    %cst_14 = arith.constant 0.000000e+00 : f32
    %25 = vector.broadcast %cst_14 : f32 to vector<8x512xf32>
    %26 = arith.select %24, %15, %25 : vector<8x512xi1>, vector<8x512xf32>
    %cst_15 = arith.constant dense<0.000000e+00> : vector<8xf32>
    %27 = vector.multi_reduction <add>, %26, %cst_15 [1] : vector<8x512xf32> to vector<8xf32>
    %28 = vector.shape_cast %27 : vector<8xf32> to vector<8x1xf32>
    %29 = arith.mulf %26, %26 : vector<8x512xf32>
    %cst_16 = arith.constant dense<0.000000e+00> : vector<8xf32>
    %30 = vector.multi_reduction <add>, %29, %cst_16 [1] : vector<8x512xf32> to vector<8xf32>
    %31 = vector.shape_cast %30 : vector<8xf32> to vector<8x1xf32>
    %32 = tpu.concatenate %28, %31 in 1 : vector<8x1xf32>, vector<8x1xf32> -> vector<8x2xf32>
    %c0_i32 = arith.constant 0 : i32
    %33 = arith.cmpi eq, %arg1, %c0_i32 : i32
    %34 = arith.extui %33 : i1 to i32
    %c0_i32_17 = arith.constant 0 : i32
    %35 = arith.cmpi ne, %34, %c0_i32_17 : i32
    scf.if %35 {
      %cst_24 = arith.constant 0.000000e+00 : f32
      %42 = vector.broadcast %cst_24 : f32 to vector<8x2xf32>
      %c0_25 = arith.constant 0 : index
      %c0_26 = arith.constant 0 : index
      %c0_27 = arith.constant 0 : index
      %43 = vector.load %arg5[%c0_25, %c0_26, %c0_27] : memref<1x8x2xf32, #tpu.memory_space<vmem>>, vector<1x8x2xf32>
      %44 = vector.shape_cast %43 : vector<1x8x2xf32> to vector<8x2xf32>
      %45 = vector.shape_cast %42 : vector<8x2xf32> to vector<1x8x2xf32>
      tpu.vector_store %arg5[%c0_25, %c0_26, %c0_27], %45 {strides = array<i32>} : memref<1x8x2xf32, #tpu.memory_space<vmem>>, vector<1x8x2xf32>,
    } else {
    }
    %c0_18 = arith.constant 0 : index
    %c0_19 = arith.constant 0 : index
    %c0_20 = arith.constant 0 : index
    %36 = vector.load %arg5[%c0_18, %c0_19, %c0_20] : memref<1x8x2xf32, #tpu.memory_space<vmem>>, vector<1x8x2xf32>
    %37 = vector.shape_cast %36 : vector<1x8x2xf32> to vector<8x2xf32>
    %38 = arith.addf %37, %32 : vector<8x2xf32>
    %c0_21 = arith.constant 0 : index
    %c0_22 = arith.constant 0 : index
    %c0_23 = arith.constant 0 : index
    %39 = vector.load %arg5[%c0_21, %c0_22, %c0_23] : memref<1x8x2xf32, #tpu.memory_space<vmem>>, vector<1x8x2xf32>
    %40 = vector.shape_cast %39 : vector<1x8x2xf32> to vector<8x2xf32>
    %41 = vector.shape_cast %38 : vector<8x2xf32> to vector<1x8x2xf32>
    tpu.vector_store %arg5[%c0_21, %c0_22, %c0_23], %41 {strides = array<i32>} : memref<1x8x2xf32, #tpu.memory_space<vmem>>, vector<1x8x2xf32>,
    return
  }
  func.func @transform_0(%arg0: i32, %arg1: i32) -> (i32, i32, i32) {
    %c0_i32 = arith.constant 0 : i32
    %c0_i32_0 = arith.constant 0 : i32
    return %arg0, %c0_i32, %arg1 : i32, i32, i32
  }
  func.func @transform_1(%arg0: i32, %arg1: i32) -> (i32, i32, i32) {
    %c0_i32 = arith.constant 0 : i32
    %c0_i32_0 = arith.constant 0 : i32
    %c0_i32_1 = arith.constant 0 : i32
    %c0_i32_2 = arith.constant 0 : i32
    return %c0_i32, %c0_i32_0, %c0_i32_1 : i32, i32, i32
  }
  func.func @transform_2(%arg0: i32, %arg1: i32) -> (i32, i32, i32) {
    %c0_i32 = arith.constant 0 : i32
    %c0_i32_0 = arith.constant 0 : i32
    return %arg0, %c0_i32, %arg1 : i32, i32, i32
  }
  func.func @transform_3(%arg0: i32, %arg1: i32) -> (i32, i32, i32) {
    %c0_i32 = arith.constant 0 : i32
    %c0_i32_0 = arith.constant 0 : i32
    %c0_i32_1 = arith.constant 0 : i32
    return %arg0, %c0_i32, %c0_i32_0 : i32, i32, i32
  }
}

module attributes {stable_mosaic.version = 11 : i64} {
  func.func @kernel(%arg0: i32, %arg1: i32, %arg2: memref<1x8x512xf32, #tpu.memory_space<vmem>>, %arg3: memref<8x1xf32, #tpu.memory_space<vmem>>, %arg4: memref<8x1xf32, #tpu.memory_space<vmem>>, %arg5: memref<1x8x512xf32, #tpu.memory_space<vmem>>) attributes {dimension_semantics = [#tpu.dimension_semantics<parallel>, #tpu.dimension_semantics<parallel>], iteration_bounds = array<i64: 2, 1>, scalar_prefetch = 0 : i64, scratch_operands = 0 : i64, tpu.core_type = #tpu.core_type<tc>, window_params = [{transform_indices = @transform_0, window_bounds = array<i64: 1, 8, 512>}, {pipeline_mode = #tpu.pipeline_mode<synchronous>, transform_indices = @transform_1, window_bounds = array<i64: 8, 1>}, {pipeline_mode = #tpu.pipeline_mode<synchronous>, transform_indices = @transform_2, window_bounds = array<i64: 8, 1>}, {transform_indices = @transform_3, window_bounds = array<i64: 1, 8, 512>}]} {
    %c0 = arith.constant 0 : index
    %c0_0 = arith.constant 0 : index
    %c0_1 = arith.constant 0 : index
    %0 = vector.load %arg2[%c0, %c0_0, %c0_1] : memref<1x8x512xf32, #tpu.memory_space<vmem>>, vector<1x8x512xf32>
    %1 = vector.shape_cast %0 : vector<1x8x512xf32> to vector<8x512xf32>
    %c0_2 = arith.constant 0 : index
    %c0_3 = arith.constant 0 : index
    %2 = vector.load %arg3[%c0_2, %c0_3] : memref<8x1xf32, #tpu.memory_space<vmem>>, vector<8x1xf32>
    %3 = vector.broadcast %2 : vector<8x1xf32> to vector<8x512xf32>
    %4 = arith.mulf %1, %3 : vector<8x512xf32>
    %c0_4 = arith.constant 0 : index
    %c0_5 = arith.constant 0 : index
    %5 = vector.load %arg4[%c0_4, %c0_5] : memref<8x1xf32, #tpu.memory_space<vmem>>, vector<8x1xf32>
    %6 = vector.broadcast %5 : vector<8x1xf32> to vector<8x512xf32>
    %7 = arith.addf %4, %6 : vector<8x512xf32>
    %cst = arith.constant 0.000000e+00 : f32
    %8 = vector.broadcast %cst : f32 to vector<8x512xf32>
    %9 = arith.cmpf oge, %7, %8 : vector<8x512xf32>
    %cst_6 = arith.constant 3.000000e-01 : f32
    %10 = vector.broadcast %cst_6 : f32 to vector<8x512xf32>
    %11 = arith.mulf %10, %7 : vector<8x512xf32>
    %12 = arith.select %9, %7, %11 : vector<8x512xi1>, vector<8x512xf32>
    %c0_7 = arith.constant 0 : index
    %c0_8 = arith.constant 0 : index
    %c0_9 = arith.constant 0 : index
    %13 = vector.load %arg5[%c0_7, %c0_8, %c0_9] : memref<1x8x512xf32, #tpu.memory_space<vmem>>, vector<1x8x512xf32>
    %14 = vector.shape_cast %13 : vector<1x8x512xf32> to vector<8x512xf32>
    %15 = vector.shape_cast %12 : vector<8x512xf32> to vector<1x8x512xf32>
    tpu.vector_store %arg5[%c0_7, %c0_8, %c0_9], %15 {strides = array<i32>} : memref<1x8x512xf32, #tpu.memory_space<vmem>>, vector<1x8x512xf32>,
    return
  }
  func.func @transform_0(%arg0: i32, %arg1: i32) -> (i32, i32, i32) {
    %c0_i32 = arith.constant 0 : i32
    %c0_i32_0 = arith.constant 0 : i32
    return %arg0, %c0_i32, %arg1 : i32, i32, i32
  }
  func.func @transform_1(%arg0: i32, %arg1: i32) -> (i32, i32) {
    %c0_i32 = arith.constant 0 : i32
    %c0_i32_0 = arith.constant 0 : i32
    %c0_i32_1 = arith.constant 0 : i32
    return %c0_i32, %c0_i32_0 : i32, i32
  }
  func.func @transform_2(%arg0: i32, %arg1: i32) -> (i32, i32) {
    %c0_i32 = arith.constant 0 : i32
    %c0_i32_0 = arith.constant 0 : i32
    %c0_i32_1 = arith.constant 0 : i32
    return %c0_i32, %c0_i32_0 : i32, i32
  }
  func.func @transform_3(%arg0: i32, %arg1: i32) -> (i32, i32, i32) {
    %c0_i32 = arith.constant 0 : i32
    %c0_i32_0 = arith.constant 0 : i32
    return %arg0, %c0_i32, %arg1 : i32, i32, i32
  }
}

</mosaic_0001>

<bundles_post_ra>
// kernel: sinc_filter_forward.2
= control target key start
LH: loop header
LB: loop body
LE: loop exit
PB: predicated region body
PF: predicated region fallthrough
CT: control target
= control target key end

     0   :  { %s1001_s12 = smov 0   ;;  %s1003_s13 = smov 0   ;;  %s1076_s0 = inlined_call_operand.vmem [shape: f32[2,19,512], index: 0, kind: input, shape index: {}]   ;;  %s1077_s1 = inlined_call_operand.vmem [shape: f32[3,8,19], index: 1, kind: input, shape index: {}]   ;;  %s1078_s2 = inlined_call_operand.vmem [shape: f32[2,8,512], index: 2, kind: output, shape index: {0}]   ;;  %s1079_s3 = inlined_call_operand.vmem [shape: f32[2,8,2], index: 3, kind: output, shape index: {1}]  }
   0x1   :  { %s1005_s14 = smov 0  }
   0x2 LB: > { %s26_s15 = sadd.s32 1, %s974_s13  ;;  %p878_p0 = scmp.ge.s32.totalorder %s978_s14, 1  ;;  %s978_s14 = sphi %s1005_s14, %s14_s14   ;;  %s974_s13 = sphi %s1003_s13, %s1081_s13   ;;  %s970_s12 = sphi %s1001_s12, %s1080_s12  }
   0x3   : > { %p28_p1 = scmp.ge.s32.totalorder %s26_s15, 2  ;;  %p161_p2 = scmp.lt.s32.totalorder %s978_s14, 3 }
   0x5   : > { %s1083_s15 = smov (%p28_p1, %s26_s15), 0  ;;  %p162_p3 = pnand %p878_p0, %p161_p2 }
   0x6   : > { %p198_p4 = scmp.lt.s32.totalorder (!%p162_p3), %s970_s12, 1  ;;  %v980_v0 = vmov (!%p162_p3), 0.0   ;;  %vm238_vm0 = vcmask (!%p162_p3), 1042432   ;;  %v233_v16 = vld [vmem:[%s1077_s1] sm:$0xff] (!%p162_p3)  ;;  %vm234_vm1 = vcmask (!%p162_p3), 154624   ;;  %v889_v18 = vld [vmem:[%s1077_s1 + $0x8] sm:$0xff] (!%p162_p3)  ;;  %v711_v25 = vlaneseq (!%p162_p3) }
   0x7   : > { %165 = sbr.rel (%p162_p3) target bundleno = 407 (0x197), region = 28  ;;  %315 = vmatprep.mubr.f32.mxu0 (!%p162_p3), %v980_v0  ;;  %386 = vmatprep.mubr.f32.mxu1 (!%p162_p3), %v980_v0  ;;  %v896_v19 = vld [vmem:[%s1077_s1 + $0x10] sm:$0xff] (!%p162_p3)  ;;  %vm750_vm3 = vcmask (!%p162_p3), 15360   ;;  %vm744_vm4 = vcmask (!%p162_p3), 7168  }
   0x8   : > { %v712_v36 = vand.u32 (!%p162_p3), 127, %v711_v25 }
   0xa   : > { %vm722_vm2 = vcmp.lt.s32.totalorder (!%p162_p3), %v712_v36, 16 }
   0xe   : > { %s1085_s12 = smov (!%p198_p4, %s970_s12), 1 }
   0xf   : > { %s930_s16 = smul.u32 96, %s1085_s12  ;;  %s905_s26 = sshll.u32 %s1085_s12, 5 }
  0x10   : > { %s215_s29 = scalar_lea.vmem %s1078_s2, %s905_s26  ;;  %s882_s30 = sshll.u32 %s1085_s12, 3 }
  0x11   : > { %s205_s19 = scalar_lea.vmem %s1076_s0, %s930_s16  ;;  %s220_s6 = scalar_lea.vmem %s1079_s3, %s882_s30 }
  0x12   : > { %v222_v1 = vld [vmem:[%s205_s19 + $0x8] sm:$0xff]  ;;  %v221_v3 = vld [vmem:[%s205_s19] sm:$0xff]  ;;  %v224_v8 = vld [vmem:[%s205_s19 + $0x18] sm:$0xff]  ;;  %751 = vst.msk [vmem:[%s220_s6] sm:$0xff] %vm750_vm3, %v980_v0 }
  0x13   : > { %v226_v2 = vld [vmem:[%s205_s19 + $0x28] sm:$0xff]  ;;  %v225_v5 = vld [vmem:[%s205_s19 + $0x20] sm:$0xff]  ;;  %v228_v9 = vld [vmem:[%s205_s19 + $0x38] sm:$0xff] }
  0x14   : > { %v906_v4 = vpack.c.bf16 %v226_v2, %v222_v1  ;;  %v230_v6 = vld [vmem:[%s205_s19 + $0x48] sm:$0x7]  ;;  %v908_v7 = vpack.c.bf16 %v225_v5, %v221_v3  ;;  %v223_v10 = vld [vmem:[%s205_s19 + $0x10] sm:$0xff]  ;;  %v910_v11 = vpack.c.bf16 %v228_v9, %v224_v8  ;;  %v232_v14 = vld [vmem:[%s205_s19 + $0x58] sm:$0x7] }
  0x15   : > { %v227_v12 = vld [vmem:[%s205_s19 + $0x30] sm:$0xff]  ;;  %v229_v15 = vld [vmem:[%s205_s19 + $0x40] sm:$0x7] }
  0x16   : > { %907 = vmatprep.subr.bf16.mxu0 %v906_v4  ;;  %v912_v13 = vpack.c.bf16 %v227_v12, %v223_v10  ;;  %911 = vmatprep.subr.bf16.mxu1 %v910_v11  ;;  %v231_v17 = vld [vmem:[%s205_s19 + $0x50] sm:$0x7] }
  0x17   : > { %909 = vmatpush1.bf16.msra.mxu0 %v908_v7 }
  0x18   : > { %883 = vmatprep.subr.msk.mxu0 %vm238_vm0, %v230_v6  ;;  %913 = vmatpush1.bf16.msra.mxu1 %v912_v13 }
  0x19   : > { %886 = vmatprep.subr.msk.mxu1 %vm238_vm0, %v232_v14  ;;  %v752_v57 = vld [vmem:[%s220_s6] sm:$0xff] }
  0x1b   : > { %884 = vmatpush1.msk.msra.mxu0 %vm238_vm0, %v229_v15 }
  0x1c   : > { %885 = vmatmul.mubr.msk.f32.vlgmr.msra.gmra.mrb[0].mxu0 %vm234_vm1, %v233_v16  ;;  %915 = vmatprep.subr.bf16.mxu0 %v906_v4 }
  0x1d   : > { %917 = vmatpush1.bf16.msra.mxu0 %v908_v7  ;;  %466 = vmatprep.mubr.f32.mxu0 %v980_v0 }
  0x1e   : > { %890 = vmatprep.subr.msk.mxu0 %vm238_vm0, %v230_v6  ;;  %887 = vmatpush1.msk.msra.mxu1 %vm238_vm0, %v231_v17 }
  0x1f   : > { %919 = vmatprep.subr.bf16.mxu1 %v910_v11  ;;  %888 = vmatmul.mubr.msk.f32.vlgmr.msra.gmra.mrb[0].mxu1 %vm234_vm1, %v233_v16 }
  0x20   : > { %921 = vmatpush1.bf16.msra.mxu1 %v912_v13  ;;  %537 = vmatprep.mubr.f32.mxu1 %v980_v0 }
  0x21   : > { %891 = vmatpush1.msk.msra.mxu0 %vm238_vm0, %v229_v15  ;;  %893 = vmatprep.subr.msk.mxu1 %vm238_vm0, %v232_v14 }
  0x22   : > { %892 = vmatmul.mubr.msk.f32.vlgmr.msra.gmra.mrb[2].mxu0 %vm234_vm1, %v889_v18  ;;  %923 = vmatprep.subr.bf16.mxu0 %v906_v4 }
  0x23   : > { %925 = vmatpush1.bf16.msra.mxu0 %v908_v7  ;;  %621 = vmatprep.mubr.f32.mxu0 %v980_v0 }
  0x24   : > { %897 = vmatprep.subr.msk.mxu0 %vm238_vm0, %v230_v6  ;;  %894 = vmatpush1.msk.msra.mxu1 %vm238_vm0, %v231_v17 }
  0x25   : > { %927 = vmatprep.subr.bf16.mxu1 %v910_v11  ;;  %895 = vmatmul.mubr.msk.f32.vlgmr.msra.gmra.mrb[2].mxu1 %vm234_vm1, %v889_v18 }
  0x26   : > { %929 = vmatpush1.bf16.msra.mxu1 %v912_v13  ;;  %692 = vmatprep.mubr.f32.mxu1 %v980_v0 }
  0x27   : > { %898 = vmatpush1.msk.msra.mxu0 %vm238_vm0, %v229_v15  ;;  %900 = vmatprep.subr.msk.mxu1 %vm238_vm0, %v232_v14 }
  0x28   : > { %899 = vmatmul.mubr.msk.f32.vlgmr.msra.gmra.mrb[4].mxu0 %vm234_vm1, %v896_v19 }
  0x2a   : > { %901 = vmatpush1.msk.msra.mxu1 %vm238_vm0, %v231_v17 }
  0x2b   : > { %902 = vmatmul.mubr.msk.f32.vlgmr.msra.gmra.mrb[4].mxu1 %vm234_vm1, %v896_v19 }
  0xef   : > { %v317_v20 = vpop.f32.mrb[0].mxu0 }
  0xf0   : > { %v319_v21 = vpop.f32.mrb[1].mxu0  ;;  %v393_v26 = vand.u32 2147483647, %v317_v20 }
  0xf1   : > { %v394_v29 = vand.u32 2147483647, %v319_v21 }
  0xf2   : > { %v388_v22 = vpop.f32.mrb[0].mxu1 }
  0xf3   : > { %v390_v23 = vpop.f32.mrb[1].mxu1  ;;  %v395_v31 = vand.u32 2147483647, %v388_v22 }
  0xf4   : > { %v396_v33 = vand.u32 2147483647, %v390_v23 }
  0xf5   : > { %v468_v24 = vpop.f32.mrb[2].mxu0 }
  0xf6   : > { %v544_v27 = vand.u32 2147483647, %v468_v24  ;;  %v470_v28 = vpop.f32.mrb[3].mxu0 }
  0xf7   : > { %v545_v30 = vand.u32 2147483647, %v470_v28 }
  0xf8   : > { %v548_v32 = vmax.f32.f32 %v393_v26, %v544_v27  ;;  %v539_v34 = vpop.f32.mrb[2].mxu1 }
  0xf9   : > { %v549_v35 = vmax.f32.f32 %v394_v29, %v545_v30  ;;  %v546_v37 = vand.u32 2147483647, %v539_v34  ;;  %v541_v38 = vpop.f32.mrb[3].mxu1 }
  0xfa   : > { %v547_v39 = vand.u32 2147483647, %v541_v38 }
  0xfb   : > { %v623_v40 = vpop.f32.mrb[4].mxu0  ;;  %v550_v41 = vmax.f32.f32 %v395_v31, %v546_v37 }
  0xfc   : > { %v699_v42 = vand.u32 2147483647, %v623_v40  ;;  %v625_v43 = vpop.f32.mrb[5].mxu0  ;;  %v551_v44 = vmax.f32.f32 %v396_v33, %v547_v39 }
  0xfd   : > { %v700_v45 = vand.u32 2147483647, %v625_v43 }
  0xfe   : > { %v703_v46 = vmax.f32.f32 %v548_v32, %v699_v42  ;;  %v694_v47 = vpop.f32.mrb[4].mxu1 }
  0xff   : > { %v704_v48 = vmax.f32.f32 %v549_v35, %v700_v45  ;;  %v701_v49 = vand.u32 2147483647, %v694_v47  ;;  %v696_v50 = vpop.f32.mrb[5].mxu1 }
 0x100   : > { %v726_v51 = vsel %vm722_vm2, %v703_v46, 0.0  ;;  %707 = vst [vmem:[%s215_s29] sm:$0xff] %v703_v46  ;;  %v702_v52 = vand.u32 2147483647, %v696_v50 }
 0x101   : > { %708 = vst [vmem:[%s215_s29 + $0x8] sm:$0xff] %v704_v48  ;;  %733 = vadd.xlane.f32.xlu0 %v726_v51  ;;  %v705_v53 = vmax.f32.f32 %v550_v41, %v701_v49  ;;  %v735_v55 = vmul.f32 %v726_v51, %v726_v51 }
 0x102   : > { %v706_v54 = vmax.f32.f32 %v551_v44, %v702_v52 }
 0x103   : > { %709 = vst [vmem:[%s215_s29 + $0x10] sm:$0xff] %v705_v53 }
 0x104   : > { %710 = vst [vmem:[%s215_s29 + $0x18] sm:$0xff] %v706_v54 }
 0x105   : > { %742 = vadd.xlane.f32.xlu0 %v735_v55 }
 0x18e   : > { %v734_v56 = vpop.xlane.xlu0 %733 }
 0x192   : > { %v743_v58 = vpop.xlane.xlu0 %742 }
 0x193   : > { %v745_v59 = vsel %vm744_vm4, %v734_v56, %v743_v58 }
 0x194   : > { %v753_v60 = vadd.f32 %v752_v57, %v745_v59 }
 0x196   : > { %755 = vst.msk [vmem:[%s220_s6] sm:$0xff] %vm750_vm3, %v753_v60 }
 0x197 PF: > { %s14_s14 = sadd.s32 1, %s978_s14   ;;  %s1080_s12 = smov %s974_s13 }
 0x198   : > { %p11_p5 = scmp.ge.s32.totalorder %s14_s14, 4   ;;  %s1081_s13 = smov %s1083_s15 }
 0x19a   :  { %13 = sbr.rel (!%p11_p5) target bundleno = 2 (0x2), region = 76 }

// kernel: sinc_filter_forward.3
= control target key start
LH: loop header
LB: loop body
LE: loop exit
PB: predicated region body
PF: predicated region fallthrough
CT: control target
= control target key end

     0   :  { %s421_s12 = smov 0   ;;  %s423_s13 = smov 0   ;;  %s460_s0 = inlined_call_operand.vmem [shape: f32[2,8,512], index: 0, kind: input, shape index: {}, may-alias: {0,3}]   ;;  %s461_s1 = inlined_call_operand.vmem [shape: f32[8,1], index: 1, kind: input, shape index: {}]   ;;  %s462_s2 = inlined_call_operand.vmem [shape: f32[8,1], index: 2, kind: input, shape index: {}]   ;;  %s463_s3 = inlined_call_operand.vmem [shape: f32[2,8,512], index: 3, kind: output, shape index: {}, may-alias: {0,3}]  }
   0x1   :  { %s425_s14 = smov 0  }
   0x2 LB: > { %s25_s15 = sadd.s32 1, %s394_s13  ;;  %p341_p0 = scmp.ge.s32.totalorder %s398_s14, 1  ;;  %s398_s14 = sphi %s425_s14, %s13_s14   ;;  %s394_s13 = sphi %s423_s13, %s465_s13   ;;  %s390_s12 = sphi %s421_s12, %s464_s12  }
   0x3   : > { %p27_p1 = scmp.ge.s32.totalorder %s25_s15, 2  ;;  %p158_p2 = scmp.lt.s32.totalorder %s398_s14, 3 }
   0x5   : > { %s467_s15 = smov (%p27_p1, %s25_s15), 0  ;;  %p159_p3 = pnand %p341_p0, %p158_p2 }
   0x6   : > { %v214_v0 = vld [vmem:[%s461_s1] sm:$0xff] (!%p159_p3)  ;;  %v400_v1 = vmov (!%p159_p3), 0   ;;  %p191_p4 = scmp.lt.s32.totalorder (!%p159_p3), %s390_s12, 1 }
   0x7   : > { %162 = sbr.rel (%p159_p3) target bundleno = 148 (0x94), region = 32  ;;  %375 = vset.pattern.permute.xlu0 (!%p159_p3), %v400_v1  ;;  %v224_v2 = vld [vmem:[%s462_s2] sm:$0xff] (!%p159_p3) }
   0x8   : > { %217 = vperm.xlu0 (!%p159_p3), %375, %v214_v0  }
   0xc   : > { %227 = vperm.xlu0 (!%p159_p3), %375, %v224_v2  }
   0xe   : > { %s469_s12 = smov (!%p191_p4, %s390_s12), 1 }
   0xf   : > { %s348_s20 = sshll.u32 %s469_s12, 5 }
  0x10   : > { %s198_s23 = scalar_lea.vmem %s460_s0, %s348_s20  ;;  %s208_s26 = scalar_lea.vmem %s463_s3, %s348_s20 }
  0x11   : > { %v210_v3 = vld [vmem:[%s198_s23] sm:$0xff]  ;;  %v211_v5 = vld [vmem:[%s198_s23 + $0x8] sm:$0xff]  ;;  %v212_v6 = vld [vmem:[%s198_s23 + $0x10] sm:$0xff] }
  0x12   : > { %v213_v7 = vld [vmem:[%s198_s23 + $0x18] sm:$0xff] }
  0x87   : > { %v218_v4 = vpop.permute.xlu0 %217 }
  0x88   : > { %v220_v8 = vmul.f32 %v218_v4, %v210_v3  ;;  %v221_v9 = vmul.f32 %v218_v4, %v211_v5  ;;  %v222_v10 = vmul.f32 %v218_v4, %v212_v6  ;;  %v223_v11 = vmul.f32 %v218_v4, %v213_v7 }
  0x8b   : > { %v228_v12 = vpop.permute.xlu0 %227 }
  0x8c   : > { %v230_v13 = vadd.f32 %v228_v12, %v220_v8  ;;  %v231_v14 = vadd.f32 %v228_v12, %v221_v9  ;;  %v232_v15 = vadd.f32 %v228_v12, %v222_v10  ;;  %v233_v16 = vadd.f32 %v228_v12, %v223_v11 }
  0x8e   : > { %vm234_vm0 = vcmp.ge.f32.partialorder %v230_v13, 0.0  ;;  %vm235_vm1 = vcmp.ge.f32.partialorder %v231_v14, 0.0  ;;  %vm236_vm2 = vcmp.ge.f32.partialorder %v232_v15, 0.0  ;;  %vm237_vm3 = vcmp.ge.f32.partialorder %v233_v16, 0.0 }
  0x8f   : > { %v238_v17 = vmul.f32 0.3, %v230_v13  ;;  %v239_v18 = vmul.f32 0.3, %v231_v14  ;;  %v240_v19 = vmul.f32 0.3, %v232_v15 }
  0x90   : > { %v241_v20 = vmul.f32 0.3, %v233_v16 }
  0x91   : > { %v242_v21 = vsel %vm234_vm0, %v230_v13, %v238_v17  ;;  %v243_v22 = vsel %vm235_vm1, %v231_v14, %v239_v18  ;;  %v244_v23 = vsel %vm236_vm2, %v232_v15, %v240_v19 }
  0x92   : > { %v245_v24 = vsel %vm237_vm3, %v233_v16, %v241_v20  ;;  %246 = vst [vmem:[%s208_s26] sm:$0xff] %v242_v21  ;;  %247 = vst [vmem:[%s208_s26 + $0x8] sm:$0xff] %v243_v22 }
  0x93   : > { %248 = vst [vmem:[%s208_s26 + $0x10] sm:$0xff] %v244_v23  ;;  %249 = vst [vmem:[%s208_s26 + $0x18] sm:$0xff] %v245_v24 }
  0x94 PF: > { %s13_s14 = sadd.s32 1, %s398_s14   ;;  %s464_s12 = smov %s394_s13 }
  0x95   : > { %p10_p5 = scmp.ge.s32.totalorder %s13_s14, 4   ;;  %s465_s13 = smov %s467_s15 }
  0x97   :  { %12 = sbr.rel (!%p10_p5) target bundleno = 2 (0x2), region = 62 }

</bundles_post_ra>
